<compile_context>
chip_gen: v7x
topology: tpu7x:2x2x1
jax: 0.10.0
libtpu: 0.0.40
codegen_flags: <defaults>
</compile_context>

<pallas_src>
from functools import partial
from types import SimpleNamespace

import jax
import jax.numpy as jnp
from jax import lax
from jax.experimental import pallas as pl
from jax.experimental.pallas import tpu as pltpu

_LANES = 128
_MIN_SPLIT_ROWS = 2048  # 2048 rows * 128 lanes * 4 B = 1 MiB per shard


def _cdiv(a, b):
    return -(-a // b)


def _round_up(a, m):
    return _cdiv(a, m) * m


def _device_params():
    """(max_block_rows, tensorcores_per_chip), generation-aware."""
    try:
        kind = jax.devices()[0].device_kind.lower()
    except Exception:
        kind = ""
    if "v7" in kind:
        return 4096, 2   # 2 MiB f32 blocks; 2 TensorCores per chip
    if "v6" in kind:
        return 2048, 1   # 1 MiB blocks
    return 1024, 1       # v5e / fallback: 512 KiB blocks


def _clip_boxes_kernel(x_ref, o_ref, *, width, height):
    # x_ref / o_ref: (block_rows, 128) lane-dense view of the flattened boxes.
    # flat index = row*128 + lane and 128 % 4 == 0  =>  coordinate = lane & 3.
    x = x_ref[...].astype(jnp.float32)
    coord = lax.broadcasted_iota(jnp.int32, (1, _LANES), 1) & 3
    # lo = [0, 0, -inf, -inf]*32 ; hi = [+inf, +inf, W, H]*32
    lo = jnp.where(coord < 2, 0.0, -jnp.inf).astype(jnp.float32)
    hi = jnp.where(coord == 2, width,
                   jnp.where(coord == 3, height, jnp.inf)).astype(jnp.float32)
    o_ref[...] = jnp.minimum(jnp.maximum(x, lo), hi).astype(o_ref.dtype)


def _run_clip(kernel, x2d, max_rows, n_cores, *, ragged):
    rows = x2d.shape[0]

    if rows <= max_rows:
        # Single block == full array (no 8-row rounding needed).
        num_blocks, block_rows = 1, rows
        # Split only on multi-TC parts (v7x) when each half is >= ~1 MiB;
        # on single-TC parts (v5e/v6e) the grid is a sequential loop and a
        # split is pure per-step overhead.
        if n_cores > 1 and rows >= 2 * _MIN_SPLIT_ROWS:
            block_rows = _round_up(_cdiv(rows, 2), 8)
            num_blocks = _cdiv(rows, block_rows)
    else:
        # Balanced blocks (multiples of 8 sublanes).  Pallas masks the ragged
        # boundary block, so the array itself is never padded here.
        num_blocks = _cdiv(rows, max_rows)
        block_rows = _round_up(_cdiv(rows, num_blocks), 8)
        num_blocks = _cdiv(rows, block_rows)

    params = dict(dimension_semantics=("parallel",))
    if ragged:
        # Let XLA fold the tiny tail-pad producer into the kernel operand read.
        params["allow_input_fusion"] = [True]

    return pl.pallas_call(
        kernel,
        out_shape=jax.ShapeDtypeStruct(x2d.shape, x2d.dtype),
        grid=(num_blocks,),
        in_specs=[pl.BlockSpec((block_rows, _LANES), lambda i: (i, 0))],
        out_specs=pl.BlockSpec((block_rows, _LANES), lambda i: (i, 0)),
        compiler_params=pltpu.CompilerParams(**params),
    )(x2d)


def clip_boxes(boxes, img, cfg):
    """Pallas equivalent of ClipBoxes.forward (returns clipped boxes)."""
    _, _, height, width = img.shape
    if cfg.TRAIN.RELATIVE_LABELS:
        width = 1
        height = 1

    B, N, C4 = boxes.shape
    assert C4 == 4, "boxes last dim must be 4 (x1, y1, x2, y2)"
    total = B * N * 4

    # width/height are static (they come from img.shape), so baking them as
    # constants costs no extra recompiles.  If resolution ever became a
    # runtime value, pass them as an SMEM scalar instead.
    kernel = partial(_clip_boxes_kernel, width=float(width), height=float(height))

    max_rows, n_cores = _device_params()

    if total % _LANES == 0:
        # Fast path: free bitcast reshape, no pad, no slice.
        rows = total // _LANES
        out2d = _run_clip(kernel, boxes.reshape(rows, _LANES),
                          max_rows, n_cores, ragged=False)
        return out2d.reshape(B, N, 4)

    # Ragged path: pad only the (< 128-element) tail so the flat view becomes
    # lane-dense.  Padded values clamp to 0 and are sliced off afterwards.
    rows = _cdiv(total, _LANES)
    flat = jnp.pad(boxes.reshape(-1), (0, rows * _LANES - total))
    out2d = _run_clip(kernel, flat.reshape(rows, _LANES),
                      max_rows, n_cores, ragged=True)
    return out2d.reshape(-1)[:total].reshape(B, N, 4)


def _reference(boxes, W, H):
    ref = boxes
    ref = ref.at[:, :, 0].set(jnp.maximum(ref[:, :, 0], 0.0))
    ref = ref.at[:, :, 1].set(jnp.maximum(ref[:, :, 1], 0.0))
    ref = ref.at[:, :, 2].set(jnp.minimum(ref[:, :, 2], float(W)))
    ref = ref.at[:, :, 3].set(jnp.minimum(ref[:, :, 3], float(H)))
    return ref


if __name__ == "__main__":
    key = jax.random.PRNGKey(0)
    k1, k2 = jax.random.split(key)

    cfg = SimpleNamespace(TRAIN=SimpleNamespace(RELATIVE_LABELS=False))
    cfg_rel = SimpleNamespace(TRAIN=SimpleNamespace(RELATIVE_LABELS=True))
    clip_jit = jax.jit(lambda b, i: clip_boxes(b, i, cfg))
    clip_rel_jit = jax.jit(lambda b, i: clip_boxes(b, i, cfg_rel))

    # Small shapes: img [B=2, C=4, H=16, W=16].
    B, C, H, W = 2, 4, 16, 16
    img = jnp.zeros((B, C, H, W), dtype=jnp.float32)

    # Case 1: tiny box count (total=64, not a multiple of 128 -> ragged path).
    N1 = 8
    boxes1 = jax.random.uniform(k1, (B, N1, 4), jnp.float32, -8.0, 24.0)
    out1 = jax.block_until_ready(clip_jit(boxes1, img))
    assert jnp.allclose(out1, _reference(boxes1, W, H)), "mismatch (case 1)"

    # Case 2: more boxes (total=9600 = 75*128 -> zero-copy fast path).
    N2 = 1200
    boxes2 = jax.random.uniform(k2, (B, N2, 4), jnp.float32, -8.0, 24.0)
    out2 = jax.block_until_ready(clip_jit(boxes2, img))
    assert jnp.allclose(out2, _reference(boxes2, W, H)), "mismatch (case 2)"

    # Case 3: RELATIVE_LABELS branch (clamp to [0, 1]).
    out3 = jax.block_until_ready(clip_rel_jit(boxes2, img))
    assert jnp.allclose(out3, _reference(boxes2, 1, 1)), "mismatch (case 3)"

    print("KERNEL_OK")
</pallas_src>

<mosaic_0001>
module attributes {stable_mosaic.version = 11 : i64} {
  func.func @_clip_boxes_kernel(%arg0: i32, %arg1: memref<1x128xf32, #tpu.memory_space<vmem>>, %arg2: memref<1x128xf32, #tpu.memory_space<vmem>>) attributes {dimension_semantics = [#tpu.dimension_semantics<parallel>], iteration_bounds = array<i64: 1>, scalar_prefetch = 0 : i64, scratch_operands = 0 : i64, tpu.core_type = #tpu.core_type<tc>, window_params = [{transform_indices = @transform_0, window_bounds = array<i64: 1, 128>}, {transform_indices = @transform_1, window_bounds = array<i64: 1, 128>}]} {
    %c0 = arith.constant 0 : index
    %c0_0 = arith.constant 0 : index
    %0 = vector.load %arg1[%c0, %c0_0] : memref<1x128xf32, #tpu.memory_space<vmem>>, vector<1x128xf32>
    %1 = tpu.iota {dimensions = array<i32: 1>} : vector<1x128xi32>
    %c3_i32 = arith.constant 3 : i32
    %2 = vector.broadcast %c3_i32 : i32 to vector<1x128xi32>
    %3 = arith.andi %1, %2 : vector<1x128xi32>
    %c2_i32 = arith.constant 2 : i32
    %4 = vector.broadcast %c2_i32 : i32 to vector<1x128xi32>
    %5 = arith.cmpi slt, %3, %4 : vector<1x128xi32>
    %cst = arith.constant 0.000000e+00 : f32
    %cst_1 = arith.constant 0xFF800000 : f32
    %6 = vector.broadcast %cst : f32 to vector<1x128xf32>
    %7 = vector.broadcast %cst_1 : f32 to vector<1x128xf32>
    %8 = arith.select %5, %6, %7 : vector<1x128xi1>, vector<1x128xf32>
    %c2_i32_2 = arith.constant 2 : i32
    %9 = vector.broadcast %c2_i32_2 : i32 to vector<1x128xi32>
    %10 = arith.cmpi eq, %3, %9 : vector<1x128xi32>
    %c3_i32_3 = arith.constant 3 : i32
    %11 = vector.broadcast %c3_i32_3 : i32 to vector<1x128xi32>
    %12 = arith.cmpi eq, %3, %11 : vector<1x128xi32>
    %cst_4 = arith.constant 1.600000e+01 : f32
    %cst_5 = arith.constant 0x7F800000 : f32
    %13 = vector.broadcast %cst_4 : f32 to vector<1x128xf32>
    %14 = vector.broadcast %cst_5 : f32 to vector<1x128xf32>
    %15 = arith.select %12, %13, %14 : vector<1x128xi1>, vector<1x128xf32>
    %cst_6 = arith.constant 1.600000e+01 : f32
    %16 = vector.broadcast %cst_6 : f32 to vector<1x128xf32>
    %17 = arith.select %10, %16, %15 : vector<1x128xi1>, vector<1x128xf32>
    %18 = arith.maximumf %0, %8 : vector<1x128xf32>
    %19 = arith.minimumf %18, %17 : vector<1x128xf32>
    %c0_7 = arith.constant 0 : index
    %c0_8 = arith.constant 0 : index
    %20 = vector.load %arg2[%c0_7, %c0_8] : memref<1x128xf32, #tpu.memory_space<vmem>>, vector<1x128xf32>
    tpu.vector_store %arg2[%c0_7, %c0_8], %19 {strides = array<i32>} : memref<1x128xf32, #tpu.memory_space<vmem>>, vector<1x128xf32>,
    return
  }
  func.func @transform_0(%arg0: i32) -> (i32, i32) {
    %c0_i32 = arith.constant 0 : i32
    %c0_i32_0 = arith.constant 0 : i32
    return %arg0, %c0_i32 : i32, i32
  }
  func.func @transform_1(%arg0: i32) -> (i32, i32) {
    %c0_i32 = arith.constant 0 : i32
    %c0_i32_0 = arith.constant 0 : i32
    return %arg0, %c0_i32 : i32, i32
  }
}

</mosaic_0001>

<bundles_post_ra>
// kernel: _lambda_.2
= control target key start
LH: loop header
LB: loop body
LE: loop exit
PB: predicated region body
PF: predicated region fallthrough
CT: control target
= control target key end

     0   :  { %s62_s0 = inlined_call_operand.vmem [shape: f32[64], index: 0, kind: input, shape index: {}]   ;;  %s63_s1 = inlined_call_operand.<no memory space> [shape: f32[], index: 1, kind: input, shape index: {}]   ;;  %s64_s2 = inlined_call_operand.vmem [shape: f32[1,128], index: 2, kind: output, shape index: {}]  }
   0x1   :  { %v7_v0 = vstv %s63_s1 }
   0x2   :  { %v10_v1 = vld [vmem:[%s62_s0] sm:$0x1]  ;;  %v11_v2 = vlaneseq  ;;  %v36_v6 = vmov inf   ;;  %v37_v8 = vmov -inf  }
   0x4   :  { %vm13_vm0 = vcmp.lt.s32.totalorder %v11_v2, 64  ;;  %v19_v3 = vand.u32 127, %v11_v2 }
   0x5   :  { %v14_v4 = vsel %vm13_vm0, %v10_v1, %v7_v0 }
   0x6   :  { %16 = vst [vmem:[#allocation7] sm:$0x1] %v14_v4  ;;  %v20_v5 = vand.u32 3, %v19_v3 }
   0x8   :  { %vm21_vm1 = vcmp.lt.s32.totalorder %v20_v5, 2  ;;  %vm24_vm2 = vcmp.eq.s32.totalorder %v20_v5, 3  ;;  %vm23_vm3 = vcmp.eq.s32.totalorder %v20_v5, 2 }
   0x9   :  { %v25_v7 = vsel %vm24_vm2, 16.0, %v36_v6  ;;  %v22_v9 = vsel %vm21_vm1, 0.0, %v37_v8 }
   0xa   :  { %v26_v11 = vsel %vm23_vm3, 16.0, %v25_v7 }
   0xd   :  { %v17_v10 = vld [vmem:[#allocation7] sm:$0x1] }
   0xe   :  { %v27_v12 = vmax.f32 %v17_v10, %v22_v9 }
  0x10   :  { %v28_v13 = vmin.f32 %v27_v12, %v26_v11 }
  0x12   :  { %29 = vst [vmem:[%s64_s2] sm:$0x1] %v28_v13 }

</bundles_post_ra>
